<compile_context>
chip_gen: v5e
topology: v5e:2x2
jax: 0.10.0
libtpu: 0.0.40
codegen_flags: <defaults>
</compile_context>

<pallas_src>
import functools
from typing import NamedTuple

import jax
import jax.numpy as jnp
from jax.experimental import pallas as pl
from jax.experimental.pallas import tpu as pltpu


def _round_up(x, m):
    return (x + m - 1) // m * m


def _hw_params():
    """Return (physical VMEM bytes, preferred MXU tile multiple)."""
    vmem = None
    try:
        vmem = int(pltpu.get_tpu_info().vmem_capacity_bytes)
    except Exception:
        vmem = None
    kind = ""
    try:
        kind = jax.devices()[0].device_kind.lower()
    except Exception:
        pass
    if vmem is None:
        # v4/v5e/v5p/v6e have 128 MiB VMEM per TensorCore; v7x (and unknown)
        # is treated conservatively as 64 MiB.
        vmem = (128 << 20) if any(g in kind for g in ("v4", "v5", "v6")) else (64 << 20)
    mxu = 256 if ("v6" in kind or "v7" in kind) else 128
    return vmem, mxu


class MLPPlan(NamedTuple):
    d_in: int
    d_in_p: int
    hidden: int
    hidden_p: int
    block_h: int
    d_out: int
    d_out_p: int
    block_n: int
    vmem_budget: int
    vmem_limit: int
    mxu: int


def make_plan(input_size, hidden_size, output_size):
    """Shape/hardware-dependent (batch-independent) tiling plan."""
    physical, mxu = _hw_params()
    budget = max(physical - (16 << 20), 16 << 20)   # headroom for compiler scratch
    limit = max(physical - (8 << 20), 24 << 20)

    # TODO(synk): add a d_in reduction stage for very large input_size
    # (the x and w1 tiles currently scale with the full, untiled d_in_p).
    d_in_p = _round_up(input_size, 128)             # MXU K of fc1 / lane dim of x tile
    h_full = _round_up(hidden_size, 128)
    n_full = _round_up(output_size, 128)

    # Keep both weights VMEM-resident (constant index maps => no HBM
    # re-streaming across batch tiles) when they fit in ~half the budget
    # at double-buffering.
    resident_bytes = 2 * 2 * (d_in_p * h_full + h_full * n_full)  # bf16, 2 bufs each
    if resident_bytes <= budget // 2:
        block_h, hidden_p = h_full, h_full
        block_n, d_out_p = n_full, n_full
    else:
        # Chunk the hidden (reduction) axis in MXU-friendly pieces.
        block_h = 2 * mxu
        while block_h > mxu and 2 * 2 * d_in_p * block_h > budget // 4:
            block_h //= 2
        block_h = min(block_h, h_full)
        hidden_p = _round_up(hidden_size, block_h)
        # Split d_out only when the w2 chunk would dominate the budget.
        if 2 * 2 * block_h * n_full <= budget // 4:
            block_n, d_out_p = n_full, n_full
        else:
            block_n = 2048
            while block_n > mxu and 2 * 2 * block_h * block_n > budget // 4:
                block_n //= 2
            block_n = min(block_n, n_full)
            d_out_p = _round_up(output_size, block_n)

    return MLPPlan(input_size, d_in_p, hidden_size, hidden_p, block_h,
                   output_size, d_out_p, block_n, budget, limit, mxu)


def prepare_mlp_params(plan, w1, b1, w2, b2):
    """Pad + cast ONCE (hoisted out of the per-call path).

    w1: [d_in, H], w2: [H, d_out] (transposed vs torch nn.Linear); b1/b2 1-D.
    Returns bf16 matmul operands and f32 biases padded to the plan's tile grid.
    """
    di = plan.d_in_p - plan.d_in
    dh = plan.hidden_p - plan.hidden
    dn = plan.d_out_p - plan.d_out
    w1_p = jnp.pad(w1, ((0, di), (0, dh))).astype(jnp.bfloat16)
    b1_p = jnp.pad(b1.reshape(1, -1), ((0, 0), (0, dh))).astype(jnp.float32)
    w2_p = jnp.pad(w2, ((0, dh), (0, dn))).astype(jnp.bfloat16)
    b2_p = jnp.pad(b2.reshape(1, -1), ((0, 0), (0, dn))).astype(jnp.float32)
    return w1_p, b1_p, w2_p, b2_p


def _mlp_kernel(x_ref, w1_ref, b1_ref, w2_ref, b2_ref, o_ref):
    """One (batch-tile, d_out-tile, hidden-chunk) grid step."""
    k = pl.program_id(2)

    @pl.when(k == 0)
    def _():
        o_ref[...] = jnp.zeros_like(o_ref)

    # fc1 chunk on the MXU (bf16 in, f32 accumulate); bias + ReLU in f32.
    h = jnp.dot(x_ref[...], w1_ref[...], preferred_element_type=jnp.float32)
    h = jnp.maximum(h + b1_ref[...], 0.0)
    # fc2 chunk accumulated straight into the resident f32 output block
    # (no separate accumulator scratch needed since the output is f32).
    o_ref[...] += jnp.dot(h.astype(w2_ref.dtype), w2_ref[...],
                          preferred_element_type=jnp.float32)

    @pl.when(k == pl.num_programs(2) - 1)
    def _():
        o_ref[...] = jax.nn.sigmoid(o_ref[...] + b2_ref[...])


def _choose_block_b(batch, plan):
    """Batch tile from the remaining VMEM budget; never below the whole batch
    for batch <= 512, multiples of the MXU dim (up to 1024) when splitting."""
    b_pad = _round_up(batch, 8)
    # Per-batch-row VMEM: double-buffered bf16 x slab + f32 output slab.
    per_row = 2 * plan.d_in_p * 2 + 2 * plan.block_n * 4
    fixed = (2 * 2 * (plan.d_in_p * plan.block_h + plan.block_h * plan.block_n)
             + 2 * 4 * (plan.block_h + plan.block_n))
    avail = max(plan.vmem_budget - fixed, per_row * 8)
    max_rows = max(8, (avail // per_row) // 8 * 8)

    if b_pad <= 512 and b_pad <= max_rows:
        return b_pad, b_pad                                   # single batch tile
    if max_rows >= plan.mxu:
        block_b = min((max_rows // plan.mxu) * plan.mxu, 1024)
    else:
        block_b = max_rows
    block_b = min(block_b, _round_up(b_pad, 8))
    return block_b, _round_up(b_pad, block_b)


@functools.partial(jax.jit, static_argnames=("plan",))
def mlp_forward(x, w1_p, b1_p, w2_p, b2_p, plan):
    """sigmoid(relu(x @ w1 + b1) @ w2 + b2) with pre-prepared padded params."""
    batch = x.shape[0]
    block_b, batch_p = _choose_block_b(batch, plan)

    # Only the activation is padded/cast per call.
    x_p = jnp.pad(x, ((0, batch_p - batch), (0, plan.d_in_p - plan.d_in)))
    x_p = x_p.astype(jnp.bfloat16)

    grid = (batch_p // block_b,
            plan.d_out_p // plan.block_n,
            plan.hidden_p // plan.block_h)      # reduction axis innermost

    n_bt = batch_p // block_b
    weights_resident = (plan.block_h == plan.hidden_p
                        and plan.block_n == plan.d_out_p)
    w_reads = 1 if weights_resident else n_bt
    cost = pl.CostEstimate(
        flops=2 * batch * (plan.d_in * plan.hidden + plan.hidden * plan.d_out),
        transcendentals=2 * batch * plan.d_out,     # sigmoid ~ exp + reciprocal
        bytes_accessed=(x_p.size * 2 + w_reads * (w1_p.size + w2_p.size) * 2
                        + b1_p.size * 4 + b2_p.size * 4
                        + batch_p * plan.d_out_p * 4),
    )

    # NOTE: if xprof ever shows exposed weight DMA in the inner k loop,
    # add pipeline_mode=pl.Buffered(3) on the w1/w2 specs.
    out = pl.pallas_call(
        _mlp_kernel,
        out_shape=jax.ShapeDtypeStruct((batch_p, plan.d_out_p), jnp.float32),
        grid_spec=pltpu.PrefetchScalarGridSpec(
            num_scalar_prefetch=0,
            grid=grid,
            in_specs=[
                pl.BlockSpec((block_b, plan.d_in_p), lambda i, j, k: (i, 0)),       # x
                pl.BlockSpec((plan.d_in_p, plan.block_h), lambda i, j, k: (0, k)),  # w1
                pl.BlockSpec((1, plan.block_h), lambda i, j, k: (0, k)),            # b1
                pl.BlockSpec((plan.block_h, plan.block_n), lambda i, j, k: (k, j)), # w2
                pl.BlockSpec((1, plan.block_n), lambda i, j, k: (0, j)),            # b2
            ],
            out_specs=pl.BlockSpec((block_b, plan.block_n),
                                   lambda i, j, k: (i, j)),
        ),
        compiler_params=pltpu.CompilerParams(
            dimension_semantics=("parallel", "parallel", "arbitrary"),
            vmem_limit_bytes=plan.vmem_limit,
        ),
        cost_estimate=cost,
    )(x_p, w1_p, b1_p, w2_p, b2_p)

    return out[:batch, :plan.d_out]


def init_mlp_params(key, input_size, hidden_size, output_size, dtype=jnp.float32):
    """PyTorch-style uniform(-1/sqrt(fan_in), 1/sqrt(fan_in)) init.

    Weights stored as [in_features, out_features] (transposed vs torch)."""
    k1, k2, k3, k4 = jax.random.split(key, 4)
    bound1 = 1.0 / jnp.sqrt(input_size)
    bound2 = 1.0 / jnp.sqrt(hidden_size)
    w1 = jax.random.uniform(k1, (input_size, hidden_size), dtype, -bound1, bound1)
    b1 = jax.random.uniform(k2, (hidden_size,), dtype, -bound1, bound1)
    w2 = jax.random.uniform(k3, (hidden_size, output_size), dtype, -bound2, bound2)
    b2 = jax.random.uniform(k4, (output_size,), dtype, -bound2, bound2)
    return w1, b1, w2, b2


if __name__ == "__main__":
    key = jax.random.PRNGKey(0)
    k_x, k_p = jax.random.split(key)

    batch = 8
    input_size = 32
    hidden_size = 64
    output_size = 16

    x = jax.random.normal(k_x, (batch, input_size), jnp.float32)
    w1, b1, w2, b2 = init_mlp_params(k_p, input_size, hidden_size, output_size)

    plan = make_plan(input_size, hidden_size, output_size)
    w1_p, b1_p, w2_p, b2_p = prepare_mlp_params(plan, w1, b1, w2, b2)

    out = mlp_forward(x, w1_p, b1_p, w2_p, b2_p, plan)
    out = jax.block_until_ready(out)

    # Pure-JAX f32 reference (same math as the PyTorch module).
    ref = jax.nn.sigmoid(jnp.maximum(x @ w1 + b1, 0.0) @ w2 + b2)
    assert out.shape == (batch, output_size)
    # bf16 MXU operands (f32 accumulate) -> loosened tolerance vs f32 reference.
    assert jnp.allclose(out, ref, atol=2e-2, rtol=2e-2), "mismatch vs reference"

    print("KERNEL_OK")
</pallas_src>

<mosaic_0001>
module attributes {stable_mosaic.version = 11 : i64} {
  func.func @_mlp_kernel(%arg0: i32, %arg1: i32, %arg2: i32, %arg3: memref<8x128xbf16, #tpu.memory_space<vmem>>, %arg4: memref<128x128xbf16, #tpu.memory_space<vmem>>, %arg5: memref<1x128xf32, #tpu.memory_space<vmem>>, %arg6: memref<128x128xbf16, #tpu.memory_space<vmem>>, %arg7: memref<1x128xf32, #tpu.memory_space<vmem>>, %arg8: memref<8x128xf32, #tpu.memory_space<vmem>>) attributes {dimension_semantics = [#tpu.dimension_semantics<parallel>, #tpu.dimension_semantics<parallel>, #tpu.dimension_semantics<arbitrary>], iteration_bounds = array<i64: 1, 1, 1>, scalar_prefetch = 0 : i64, scratch_operands = 0 : i64, tpu.core_type = #tpu.core_type<tc>, window_params = [{transform_indices = @transform_0, window_bounds = array<i64: 8, 128>}, {transform_indices = @transform_1, window_bounds = array<i64: 128, 128>}, {transform_indices = @transform_2, window_bounds = array<i64: 1, 128>}, {transform_indices = @transform_3, window_bounds = array<i64: 128, 128>}, {transform_indices = @transform_4, window_bounds = array<i64: 1, 128>}, {transform_indices = @transform_5, window_bounds = array<i64: 8, 128>}]} {
    %c0_i32 = arith.constant 0 : i32
    %0 = arith.cmpi eq, %arg2, %c0_i32 : i32
    %1 = arith.extui %0 : i1 to i32
    %c0_i32_0 = arith.constant 0 : i32
    %2 = arith.cmpi ne, %1, %c0_i32_0 : i32
    scf.if %2 {
      %cst_16 = arith.constant 0.000000e+00 : f32
      %20 = vector.broadcast %cst_16 : f32 to vector<8x128xf32>
      %c0_17 = arith.constant 0 : index
      %c0_18 = arith.constant 0 : index
      %21 = vector.load %arg8[%c0_17, %c0_18] : memref<8x128xf32, #tpu.memory_space<vmem>>, vector<8x128xf32>
      tpu.vector_store %arg8[%c0_17, %c0_18], %20 {strides = array<i32>} : memref<8x128xf32, #tpu.memory_space<vmem>>, vector<8x128xf32>,
    } else {
    }
    %c0 = arith.constant 0 : index
    %c0_1 = arith.constant 0 : index
    %3 = vector.load %arg3[%c0, %c0_1] : memref<8x128xbf16, #tpu.memory_space<vmem>>, vector<8x128xbf16>
    %c0_2 = arith.constant 0 : index
    %c0_3 = arith.constant 0 : index
    %4 = vector.load %arg4[%c0_2, %c0_3] : memref<128x128xbf16, #tpu.memory_space<vmem>>, vector<128x128xbf16>
    %cst = arith.constant dense<0.000000e+00> : vector<8x128xf32>
    %5 = tpu.matmul %3, %4, %cst {dimension_numbers = #tpu.dot_dimension_numbers<[1], [0], [0], [1], [0, 0, 1, 1], [], []>} : vector<8x128xbf16>, vector<128x128xbf16>, vector<8x128xf32> -> vector<8x128xf32>
    %c0_4 = arith.constant 0 : index
    %c0_5 = arith.constant 0 : index
    %6 = vector.load %arg5[%c0_4, %c0_5] : memref<1x128xf32, #tpu.memory_space<vmem>>, vector<1x128xf32>
    %7 = vector.broadcast %6 : vector<1x128xf32> to vector<8x128xf32>
    %8 = arith.addf %5, %7 : vector<8x128xf32>
    %cst_6 = arith.constant 0.000000e+00 : f32
    %9 = vector.broadcast %cst_6 : f32 to vector<8x128xf32>
    %10 = arith.maximumf %8, %9 : vector<8x128xf32>
    %c0_7 = arith.constant 0 : index
    %c0_8 = arith.constant 0 : index
    %11 = vector.load %arg8[%c0_7, %c0_8] : memref<8x128xf32, #tpu.memory_space<vmem>>, vector<8x128xf32>
    %12 = arith.truncf %10 : vector<8x128xf32> to vector<8x128xbf16>
    %c0_9 = arith.constant 0 : index
    %c0_10 = arith.constant 0 : index
    %13 = vector.load %arg6[%c0_9, %c0_10] : memref<128x128xbf16, #tpu.memory_space<vmem>>, vector<128x128xbf16>
    %cst_11 = arith.constant dense<0.000000e+00> : vector<8x128xf32>
    %14 = tpu.matmul %12, %13, %cst_11 {dimension_numbers = #tpu.dot_dimension_numbers<[1], [0], [0], [1], [0, 0, 1, 1], [], []>} : vector<8x128xbf16>, vector<128x128xbf16>, vector<8x128xf32> -> vector<8x128xf32>
    %15 = arith.addf %11, %14 : vector<8x128xf32>
    %c0_12 = arith.constant 0 : index
    %c0_13 = arith.constant 0 : index
    %16 = vector.load %arg8[%c0_12, %c0_13] : memref<8x128xf32, #tpu.memory_space<vmem>>, vector<8x128xf32>
    tpu.vector_store %arg8[%c0_12, %c0_13], %15 {strides = array<i32>} : memref<8x128xf32, #tpu.memory_space<vmem>>, vector<8x128xf32>,
    %c0_i32_14 = arith.constant 0 : i32
    %17 = arith.cmpi eq, %arg2, %c0_i32_14 : i32
    %18 = arith.extui %17 : i1 to i32
    %c0_i32_15 = arith.constant 0 : i32
    %19 = arith.cmpi ne, %18, %c0_i32_15 : i32
    scf.if %19 {
      %c0_16 = arith.constant 0 : index
      %c0_17 = arith.constant 0 : index
      %20 = vector.load %arg8[%c0_16, %c0_17] : memref<8x128xf32, #tpu.memory_space<vmem>>, vector<8x128xf32>
      %c0_18 = arith.constant 0 : index
      %c0_19 = arith.constant 0 : index
      %21 = vector.load %arg7[%c0_18, %c0_19] : memref<1x128xf32, #tpu.memory_space<vmem>>, vector<1x128xf32>
      %22 = vector.broadcast %21 : vector<1x128xf32> to vector<8x128xf32>
      %23 = arith.addf %20, %22 : vector<8x128xf32>
      %24 = arith.negf %23 : vector<8x128xf32>
      %25 = math.exp %24 : vector<8x128xf32>
      %cst_20 = arith.constant 1.000000e+00 : f32
      %26 = vector.broadcast %cst_20 : f32 to vector<8x128xf32>
      %27 = arith.addf %26, %25 : vector<8x128xf32>
      %28 = arith.divf %26, %27 : vector<8x128xf32>
      %c0_21 = arith.constant 0 : index
      %c0_22 = arith.constant 0 : index
      %29 = vector.load %arg8[%c0_21, %c0_22] : memref<8x128xf32, #tpu.memory_space<vmem>>, vector<8x128xf32>
      tpu.vector_store %arg8[%c0_21, %c0_22], %28 {strides = array<i32>} : memref<8x128xf32, #tpu.memory_space<vmem>>, vector<8x128xf32>,
    } else {
    }
    return
  }
  func.func @transform_0(%arg0: i32, %arg1: i32, %arg2: i32) -> (i32, i32) {
    %c0_i32 = arith.constant 0 : i32
    %c0_i32_0 = arith.constant 0 : i32
    return %arg0, %c0_i32 : i32, i32
  }
  func.func @transform_1(%arg0: i32, %arg1: i32, %arg2: i32) -> (i32, i32) {
    %c0_i32 = arith.constant 0 : i32
    %c0_i32_0 = arith.constant 0 : i32
    return %c0_i32, %arg2 : i32, i32
  }
  func.func @transform_2(%arg0: i32, %arg1: i32, %arg2: i32) -> (i32, i32) {
    %c0_i32 = arith.constant 0 : i32
    %c0_i32_0 = arith.constant 0 : i32
    return %c0_i32, %arg2 : i32, i32
  }
  func.func @transform_3(%arg0: i32, %arg1: i32, %arg2: i32) -> (i32, i32) {
    %c0_i32 = arith.constant 0 : i32
    return %arg2, %arg1 : i32, i32
  }
  func.func @transform_4(%arg0: i32, %arg1: i32, %arg2: i32) -> (i32, i32) {
    %c0_i32 = arith.constant 0 : i32
    %c0_i32_0 = arith.constant 0 : i32
    return %c0_i32, %arg1 : i32, i32
  }
  func.func @transform_5(%arg0: i32, %arg1: i32, %arg2: i32) -> (i32, i32) {
    %c0_i32 = arith.constant 0 : i32
    return %arg0, %arg1 : i32, i32
  }
}

</mosaic_0001>

<bundles_post_ra>
// kernel: mlp_forward.1
= control target key start
LH: loop header
LB: loop body
LE: loop exit
PB: predicated region body
PF: predicated region fallthrough
CT: control target
= control target key end

     0   :  { %10 = vsyncpa [#allocation3], 0  ;;  %s493_s0 = inlined_call_operand.vmem [shape: bf16[8,128], index: 0, kind: input, shape index: {}]   ;;  %s494_s1 = inlined_call_operand.hbm [shape: bf16[128,128], index: 1, kind: input, shape index: {}]   ;;  %s495_s2 = inlined_call_operand.vmem [shape: f32[1,128], index: 2, kind: input, shape index: {}]   ;;  %s496_s3 = inlined_call_operand.hbm [shape: bf16[128,128], index: 3, kind: input, shape index: {}]   ;;  %s497_s4 = inlined_call_operand.vmem [shape: f32[1,128], index: 4, kind: input, shape index: {}]   ;;  %s498_s5 = inlined_call_operand.hbm [shape: f32[8,128], index: 5, kind: output, shape index: {}]  }
   0x1   :  { %11 = vsyncpa [#allocation6], 0 }
   0x2   :  { %12 = vsyncpa [#allocation4], 0  ;;  %s19_s20 = sshll.u32 %s494_s1, 4  ;;  %s440_s21 = smov [#allocation2]   ;;  %s20_s20 = int_to_ptr.hbm [resolvable:$true] %s19_s20 }
   0x3   :  { %s21_s22 = sshll.u32 %s440_s21, 4  ;;  %s34_s25 = sshll.u32 %s496_s3, 4  ;;  %s22_s22 = int_to_ptr.vmem [resolvable:$true] %s21_s22  ;;  %s35_s25 = int_to_ptr.hbm [resolvable:$true] %s34_s25 }
   0x4   :  { %s441_s26 = smov 64   ;;  %s442_s27 = smov 4  }
   0x5   :  { %27 = dma.hbm_to_vmem [thread:$0]  %s20_s20, 1024, %s22_s22, [#allocation3], %s441_s26, %s441_s26, %s442_s27  }
   0x6   :  { %s443_s28 = smov [#allocation5]  }
   0x7   :  { %s36_s29 = sshll.u32 %s443_s28, 4  ;;  %s37_s29 = int_to_ptr.vmem [resolvable:$true] %s36_s29 }
   0x8   :  { %42 = dma.hbm_to_vmem [thread:$0]  %s35_s25, 1024, %s37_s29, [#allocation6], %s441_s26, %s441_s26, %s442_s27  }
   0x9   :  { %434 = dma.done.wait [#allocation3], 1024  }
   0xa   :  { %435 = vsyncadd [#allocation3], 4294966272 }
   0xb   :  { %436 = dma.done.wait [#allocation6], 1024  }
   0xc   :  { %437 = vsyncadd [#allocation6], 4294966272  ;;  %v341_v0 = vld [vmem:[#allocation2 + $0x38] sm:$0xff]  ;;  %v340_v1 = vld [vmem:[#allocation2 + $0x30] sm:$0xff] }
   0xd   :  { %127 = vmatpush.bf16.msra.mxu0 %v341_v0  ;;  %v349_v2 = vld [vmem:[#allocation5 + $0x38] sm:$0xff]  ;;  %v348_v3 = vld [vmem:[#allocation5 + $0x30] sm:$0xff]  ;;  %v339_v4 = vld [vmem:[#allocation2 + $0x28] sm:$0xff] }
   0xe   :  { %207 = vmatpush.bf16.msra.mxu1 %v349_v2  ;;  %v347_v5 = vld [vmem:[#allocation5 + $0x28] sm:$0xff]  ;;  %v338_v6 = vld [vmem:[#allocation2 + $0x20] sm:$0xff]  ;;  %v337_v8 = vld [vmem:[#allocation2 + $0x18] sm:$0xff] }
   0xf   :  { %v346_v7 = vld [vmem:[#allocation5 + $0x20] sm:$0xff]  ;;  %v345_v9 = vld [vmem:[#allocation5 + $0x18] sm:$0xff]  ;;  %v336_v10 = vld [vmem:[#allocation2 + $0x10] sm:$0xff] }
  0x10   :  { %v344_v11 = vld [vmem:[#allocation5 + $0x10] sm:$0xff]  ;;  %v335_v12 = vld [vmem:[#allocation2 + $0x8] sm:$0xff]  ;;  %v334_v13 = vld [vmem:[#allocation2] sm:$0xff] }
  0x11   :  { %128 = vmatpush.bf16.msra.mxu0 %v340_v1  ;;  %v58_v14 = vld [vmem:[%s493_s0] sm:$0xf]  ;;  %v343_v15 = vld [vmem:[#allocation5 + $0x8] sm:$0xff]  ;;  %s444_s0 = smov [#allocation7]  }
  0x12   :  { %208 = vmatpush.bf16.msra.mxu1 %v348_v3  ;;  %v342_v16 = vld [vmem:[#allocation5] sm:$0xff] }
  0x13   :  { %v356_v17 = vld [vmem:[%s495_s2] ss:$0 sm:$0xff]  ;;  %s256_s2 = sshll.u32 %s444_s0, 4  ;;  %s257_s2 = int_to_ptr.vmem [resolvable:$true] %s256_s2 }
  0x14   :  { %v357_v23 = vld [vmem:[%s497_s4] ss:$0 sm:$0xff]  ;;  %s258_s4 = sshll.u32 %s498_s5, 4  ;;  %s259_s4 = int_to_ptr.hbm [resolvable:$true] %s258_s4 }
  0x15   :  { %129 = vmatpush.bf16.msra.mxu0 %v339_v4 }
  0x16   :  { %209 = vmatpush.bf16.msra.mxu1 %v347_v5 }
  0x19   :  { %130 = vmatpush.bf16.msra.mxu0 %v338_v6 }
  0x1a   :  { %210 = vmatpush.bf16.msra.mxu1 %v346_v7 }
  0x1d   :  { %131 = vmatpush.bf16.msra.mxu0 %v337_v8 }
  0x1e   :  { %211 = vmatpush.bf16.msra.mxu1 %v345_v9 }
  0x21   :  { %132 = vmatpush.bf16.msra.mxu0 %v336_v10 }
  0x22   :  { %212 = vmatpush.bf16.msra.mxu1 %v344_v11 }
  0x25   :  { %133 = vmatpush.bf16.msra.mxu0 %v335_v12 }
  0x26   :  { %213 = vmatpush.bf16.msra.mxu1 %v343_v15 }
  0x29   :  { %134 = vmatpush.bf16.msra.mxu0 %v334_v13 }
  0x2a   :  { %214 = vmatpush.bf16.msra.mxu1 %v342_v16 }
  0x2c   :  { %135 = vmatmul.bf16.vlgmr.msra.gmra.mxu0 %v58_v14 }
  0xa9   :  { %v136_v18 = vpop.f32.mrf.mxu0 }
  0xaa   :  { %v137_v19 = vadd.f32 %v356_v17, %v136_v18 }
  0xac   :  { %v140_v20 = vmax.f32 %v137_v19, 0.0 }
  0xae   :  { %v142_v21 = vpack.c.bf16 %v140_v20, %v140_v20 }
  0xb0   :  { %215 = vmatmul.bf16.vlgmr.msra.gmra.mxu1 %v142_v21 }
  0xb1   :  { %v138_v22 = vpop.f32.mrf.mxu0 }
 0x12d   :  { %v216_v24 = vpop.f32.mrf.mxu1 }
 0x12e   :  { %v230_v25 = vadd.f32 %v357_v23, %v216_v24 }
 0x130   :  { %v333_v26 = vmul.f32 -1.442695, %v230_v25 }
 0x132   :  { %358 = vpow2.f32 %v333_v26 }
 0x135   :  { %v218_v27 = vpop.f32.mrf.mxu1 }
 0x138   :  { %v359_v28 = vpop.eup %358 }
 0x139   :  { %v234_v29 = vadd.f32 1.0, %v359_v28 }
 0x13b   :  { %360 = vrcp.f32 %v234_v29  ;;  %v246_v33 = vand.u32 2147483648, %v234_v29  ;;  %v244_v35 = vand.u32 2147483647, %v234_v29  ;;  %vm240_vm1 = vweird.f32 %v234_v29 }
 0x13d   :  { %v247_v37 = vor.u32 1.1754944e-38, %v246_v33  ;;  %vm245_vm3 = vcmp.eq.f32.partialorder %v244_v35, 8.507059e+37 }
 0x141   :  { %v361_v30 = vpop.eup %360 }
 0x142   :  { %v236_v31 = vmul.f32 %v361_v30, %v234_v29  ;;  %vm241_vm0 = vweird.f32 %v361_v30 }
 0x143   :  { %vm242_vm2 = vmor %vm240_vm1, %vm241_vm0 }
 0x144   :  { %v237_v32 = vsub.f32 1.0, %v236_v31 }
 0x146   :  { %v238_v34 = vmul.f32 %v361_v30, %v237_v32 }
 0x148   :  { %v239_v36 = vadd.f32 %v361_v30, %v238_v34 }
 0x14a   :  { %v243_v38 = vsel %vm242_vm2, %v361_v30, %v239_v36 }
 0x14b   :  { %v248_v39 = vsel %vm245_vm3, %v247_v37, %v243_v38 }
 0x14c   :  { %250 = vst [vmem:[#allocation7] sm:$0xff] %v248_v39 }
 0x14d   :  { %261 = dma.vmem_to_hbm [thread:$0]  %s257_s2, 128, %s259_s4, [#allocation4]  }
 0x14e   :  { %438 = dma.done.wait [#allocation4], 128  }
 0x14f   :  { %439 = vsyncadd [#allocation4], 4294967168 }
 0x150   :  { %266 = vsyncpa [#allocation3], 1 }
 0x151   :  { %267 = vsyncpa [#allocation6], 1 }
 0x152   :  { %268 = vsyncpa [#allocation4], 1 }

</bundles_post_ra>
